<compile_context>
chip_gen: v7x
topology: tpu7x:2x2x1
jax: 0.10.0
libtpu: 0.0.40
codegen_flags: <defaults>
</compile_context>

<pallas_src>
import functools

import jax
import jax.numpy as jnp
from jax.experimental import pallas as pl
from jax.experimental.pallas import tpu as pltpu


def _round_up(x, m):
    return ((x + m - 1) // m) * m


_VMEM_LIMIT = 32 * 1024 * 1024  # explicit scoped-VMEM request (safe on v5e/v6e/v7x)


# ----------------------------------------------------------------------------
# Kernel 1: feature transform  H = X @ W   (bf16 inputs on MXU, f32 accumulate)
# ----------------------------------------------------------------------------
def _feature_transform_kernel(x_ref, w_ref, h_ref):
    x = x_ref[...].astype(jnp.bfloat16)
    w = w_ref[...].astype(jnp.bfloat16)
    h = jnp.dot(x, w, preferred_element_type=jnp.float32)
    h_ref[...] = h.astype(h_ref.dtype)


def feature_transform(x, w, *, tile):
    """x: (N_pad, Cin_pad), w: (Cin_pad, Cout_pad) -> H: (N_pad, Cout_pad) bf16."""
    n_pad, cin_pad = x.shape
    cout_pad = w.shape[1]
    flops = 2 * n_pad * cin_pad * cout_pad
    bytes_accessed = int(x.size * x.dtype.itemsize + w.size * 4
                         + n_pad * cout_pad * 2)
    return pl.pallas_call(
        _feature_transform_kernel,
        out_shape=jax.ShapeDtypeStruct((n_pad, cout_pad), jnp.bfloat16),
        grid_spec=pltpu.PrefetchScalarGridSpec(
            num_scalar_prefetch=0,
            grid=(n_pad // tile,),
            in_specs=[
                pl.BlockSpec((tile, cin_pad), lambda i: (i, 0)),
                pl.BlockSpec((cin_pad, cout_pad), lambda i: (0, 0)),
            ],
            out_specs=pl.BlockSpec((tile, cout_pad), lambda i: (i, 0)),
        ),
        compiler_params=pltpu.CompilerParams(
            dimension_semantics=("parallel",),
            vmem_limit_bytes=_VMEM_LIMIT),
        cost_estimate=pl.CostEstimate(flops=flops, transcendentals=0,
                                      bytes_accessed=bytes_accessed),
    )(x, w)


# ----------------------------------------------------------------------------
# Kernel 2: aggregation  O = A_hat @ H + bias  (+ optional BN-affine + ReLU)
# ----------------------------------------------------------------------------
def _aggregate_kernel(a_ref, h_ref, b_ref, scale_ref, shift_ref, o_ref, acc_ref,
                      *, apply_act):
    k = pl.program_id(1)

    @pl.when(k == 0)
    def _():
        acc_ref[...] = jnp.zeros_like(acc_ref)

    acc_ref[...] += jnp.dot(a_ref[...], h_ref[...],
                            preferred_element_type=jnp.float32)

    @pl.when(k == pl.num_programs(1) - 1)
    def _():
        out = acc_ref[...] + b_ref[...]            # GCNConv bias (1, Cout_pad)
        if apply_act:
            # BatchNorm1d (eval-mode stats folded into scale/shift) + ReLU, f32
            out = out * scale_ref[...] + shift_ref[...]
            out = jnp.maximum(out, 0.0)
        o_ref[...] = out.astype(o_ref.dtype)


def aggregate(a_bf16, h_bf16, b, scale, shift, *, tile, apply_act, out_dtype):
    """a: (N_pad, N_pad) bf16, h: (N_pad, Cout_pad) bf16 -> (N_pad, Cout_pad)."""
    n_pad = a_bf16.shape[0]
    cout_pad = h_bf16.shape[1]
    kernel = functools.partial(_aggregate_kernel, apply_act=apply_act)
    flops = 2 * n_pad * n_pad * cout_pad
    bytes_accessed = int(a_bf16.size * 2 + h_bf16.size * 2
                         + n_pad * cout_pad * jnp.dtype(out_dtype).itemsize)
    # TODO(synk): real graphs are sparse -- a PrefetchScalarGridSpec block-mask
    # could skip all-zero A_hat tiles; dense tiles are streamed here.
    return pl.pallas_call(
        kernel,
        out_shape=jax.ShapeDtypeStruct((n_pad, cout_pad), out_dtype),
        grid_spec=pltpu.PrefetchScalarGridSpec(
            num_scalar_prefetch=0,
            grid=(n_pad // tile, n_pad // tile),
            in_specs=[
                pl.BlockSpec((tile, tile), lambda i, k: (i, k)),        # A_hat
                pl.BlockSpec((tile, cout_pad), lambda i, k: (k, 0)),    # H
                pl.BlockSpec((1, cout_pad), lambda i, k: (0, 0)),       # bias
                pl.BlockSpec((1, cout_pad), lambda i, k: (0, 0)),       # bn scale
                pl.BlockSpec((1, cout_pad), lambda i, k: (0, 0)),       # bn shift
            ],
            out_specs=pl.BlockSpec((tile, cout_pad), lambda i, k: (i, 0)),
            scratch_shapes=[pltpu.VMEM((tile, cout_pad), jnp.float32)],
        ),
        compiler_params=pltpu.CompilerParams(
            dimension_semantics=("parallel", "arbitrary"),
            vmem_limit_bytes=_VMEM_LIMIT),
        cost_estimate=pl.CostEstimate(flops=flops, transcendentals=0,
                                      bytes_accessed=bytes_accessed),
    )(a_bf16, h_bf16, b, scale, shift)


# ----------------------------------------------------------------------------
# Glue: build D^-1/2 (A + I) D^-1/2 from edge_index (PyG gcn_norm semantics)
# ----------------------------------------------------------------------------
def normalized_adjacency(edge_index, num_nodes):
    src, dst = edge_index[0], edge_index[1]
    loop = jnp.arange(num_nodes, dtype=edge_index.dtype)
    src = jnp.concatenate([src, loop])   # add self-loops
    dst = jnp.concatenate([dst, loop])
    a = jnp.zeros((num_nodes, num_nodes), jnp.float32).at[dst, src].add(1.0)
    deg = a.sum(axis=1)                  # degree incl. self loop
    dinv = jnp.where(deg > 0.0, jax.lax.rsqrt(deg), 0.0)
    return dinv[:, None] * a * dinv[None, :]


# ----------------------------------------------------------------------------
# GCN.forward (inference): loop over layers, last layer has no BN/ReLU/dropout
# ----------------------------------------------------------------------------
def gcn_forward(x, edge_index, params):
    n, cin = x.shape

    # ---- tiling / padding (all feature dims padded to 128 lanes) ----
    if n >= 512:
        tile = 512
    else:
        tile = _round_up(max(n, 1), 128)
    n_pad = _round_up(n, tile)

    a_hat = normalized_adjacency(edge_index, n)
    a_bf16 = jnp.zeros((n_pad, n_pad), jnp.bfloat16).at[:n, :n].set(
        a_hat.astype(jnp.bfloat16))

    cin_pad = _round_up(cin, 128)
    h = jnp.zeros((n_pad, cin_pad), jnp.float32).at[:n, :cin].set(x)

    num_layers = len(params["weights"])
    for i in range(num_layers):
        w = params["weights"][i]
        b = params["biases"][i]
        c_in, c_out = w.shape
        c_in_pad = _round_up(c_in, 128)
        c_out_pad = _round_up(c_out, 128)

        w_pad = jnp.zeros((c_in_pad, c_out_pad), jnp.float32).at[
            :c_in, :c_out].set(w)
        b_pad = jnp.zeros((1, c_out_pad), jnp.float32).at[0, :c_out].set(b)

        last = (i == num_layers - 1)
        if not last:
            scale_pad = jnp.ones((1, c_out_pad), jnp.float32).at[
                0, :c_out].set(params["bn_scale"][i])
            shift_pad = jnp.zeros((1, c_out_pad), jnp.float32).at[
                0, :c_out].set(params["bn_shift"][i])
        else:
            scale_pad = jnp.ones((1, c_out_pad), jnp.float32)
            shift_pad = jnp.zeros((1, c_out_pad), jnp.float32)

        hw = feature_transform(h, w_pad, tile=tile)          # (n_pad, c_out_pad) bf16
        out_dtype = jnp.float32 if last else jnp.bfloat16
        h = aggregate(a_bf16, hw, b_pad, scale_pad, shift_pad,
                      tile=tile, apply_act=not last, out_dtype=out_dtype)
        # TODO(synk): F.dropout(training=True) not applied -- inference mode.

    c_out_final = params["weights"][-1].shape[1]
    return h[:n, :c_out_final]


def init_params(key, in_channels, hidden_channels, out_channels, num_layers=2):
    dims = [in_channels] + [hidden_channels] * (num_layers - 1) + [out_channels]
    weights, biases, bn_scale, bn_shift = [], [], [], []
    eps = 1e-5
    for i in range(num_layers):
        key, wk = jax.random.split(key)
        fan_in, fan_out = dims[i], dims[i + 1]
        limit = jnp.sqrt(6.0 / (fan_in + fan_out))      # glorot-uniform (PyG default)
        weights.append(jax.random.uniform(wk, (fan_in, fan_out), jnp.float32,
                                          -limit, limit))
        biases.append(jnp.zeros((fan_out,), jnp.float32))
        if i < num_layers - 1:
            gamma = jnp.ones((fan_out,), jnp.float32)
            beta = jnp.zeros((fan_out,), jnp.float32)
            running_mean = jnp.zeros((fan_out,), jnp.float32)
            running_var = jnp.ones((fan_out,), jnp.float32)
            scale = gamma * jax.lax.rsqrt(running_var + eps)
            shift = beta - running_mean * scale
            bn_scale.append(scale)
            bn_shift.append(shift)
    return {"weights": weights, "biases": biases,
            "bn_scale": bn_scale, "bn_shift": bn_shift}


if __name__ == "__main__":
    key = jax.random.PRNGKey(0)
    k_x, k_src, k_dst, k_param = jax.random.split(key, 4)

    num_nodes = 64
    num_edges = 256
    in_channels, hidden_channels, out_channels = 16, 32, 8

    x = jax.random.normal(k_x, (num_nodes, in_channels), jnp.float32)
    src = jax.random.randint(k_src, (num_edges,), 0, num_nodes, jnp.int32)
    dst = jax.random.randint(k_dst, (num_edges,), 0, num_nodes, jnp.int32)
    edge_index = jnp.stack([src, dst], axis=0)

    params = init_params(k_param, in_channels, hidden_channels, out_channels,
                         num_layers=2)

    out = gcn_forward(x, edge_index, params)
    jax.block_until_ready(out)
    assert out.shape == (num_nodes, out_channels)
    print("KERNEL_OK")
</pallas_src>

<mosaic_0001>
module attributes {stable_mosaic.version = 11 : i64} {
  func.func @_feature_transform_kernel(%arg0: i32, %arg1: memref<128x128xf32, #tpu.memory_space<vmem>>, %arg2: memref<128x128xf32, #tpu.memory_space<vmem>>, %arg3: memref<128x128xbf16, #tpu.memory_space<vmem>>) attributes {dimension_semantics = [#tpu.dimension_semantics<parallel>], iteration_bounds = array<i64: 1>, scalar_prefetch = 0 : i64, scratch_operands = 0 : i64, tpu.core_type = #tpu.core_type<tc>, window_params = [{transform_indices = @transform_0, window_bounds = array<i64: 128, 128>}, {pipeline_mode = #tpu.pipeline_mode<synchronous>, transform_indices = @transform_1, window_bounds = array<i64: 128, 128>}, {transform_indices = @transform_2, window_bounds = array<i64: 128, 128>}]} {
    %c0 = arith.constant 0 : index
    %c0_0 = arith.constant 0 : index
    %0 = vector.load %arg1[%c0, %c0_0] : memref<128x128xf32, #tpu.memory_space<vmem>>, vector<128x128xf32>
    %1 = arith.truncf %0 : vector<128x128xf32> to vector<128x128xbf16>
    %c0_1 = arith.constant 0 : index
    %c0_2 = arith.constant 0 : index
    %2 = vector.load %arg2[%c0_1, %c0_2] : memref<128x128xf32, #tpu.memory_space<vmem>>, vector<128x128xf32>
    %3 = arith.truncf %2 : vector<128x128xf32> to vector<128x128xbf16>
    %cst = arith.constant dense<0.000000e+00> : vector<128x128xf32>
    %4 = tpu.matmul %1, %3, %cst {dimension_numbers = #tpu.dot_dimension_numbers<[1], [0], [0], [1], [0, 0, 1, 1], [], []>} : vector<128x128xbf16>, vector<128x128xbf16>, vector<128x128xf32> -> vector<128x128xf32>
    %5 = arith.truncf %4 : vector<128x128xf32> to vector<128x128xbf16>
    %c0_3 = arith.constant 0 : index
    %c0_4 = arith.constant 0 : index
    %6 = vector.load %arg3[%c0_3, %c0_4] : memref<128x128xbf16, #tpu.memory_space<vmem>>, vector<128x128xbf16>
    tpu.vector_store %arg3[%c0_3, %c0_4], %5 {strides = array<i32>} : memref<128x128xbf16, #tpu.memory_space<vmem>>, vector<128x128xbf16>,
    return
  }
  func.func @transform_0(%arg0: i32) -> (i32, i32) {
    %c0_i32 = arith.constant 0 : i32
    %c0_i32_0 = arith.constant 0 : i32
    return %arg0, %c0_i32 : i32, i32
  }
  func.func @transform_1(%arg0: i32) -> (i32, i32) {
    %c0_i32 = arith.constant 0 : i32
    %c0_i32_0 = arith.constant 0 : i32
    %c0_i32_1 = arith.constant 0 : i32
    return %c0_i32, %c0_i32_0 : i32, i32
  }
  func.func @transform_2(%arg0: i32) -> (i32, i32) {
    %c0_i32 = arith.constant 0 : i32
    %c0_i32_0 = arith.constant 0 : i32
    return %arg0, %c0_i32 : i32, i32
  }
}

</mosaic_0001>

<bundles_post_ra>
// kernel: tpu_custom_call.1
= control target key start
LH: loop header
LB: loop body
LE: loop exit
PB: predicated region body
PF: predicated region fallthrough
CT: control target
= control target key end

     0   :  { %7 = vsyncpa [#allocation3], 0  ;;  %s564_s0 = inlined_call_operand.hbm [shape: f32[128,128], index: 0, kind: input, shape index: {}]   ;;  %s565_s1 = inlined_call_operand.hbm [shape: f32[128,128], index: 1, kind: input, shape index: {}]   ;;  %s566_s2 = inlined_call_operand.hbm [shape: bf16[128,128], index: 2, kind: output, shape index: {}]  }
   0x1   :  { %8 = vsyncpa [#allocation6], 0 }
   0x2   :  { %9 = vsyncpa [#allocation4], 0  ;;  %s506_s9 = smov [#allocation2]   ;;  %s434_s13 = scalar_lea.hbm %s564_s0, 2048 }
   0x3   :  { %s15_s10 = sshll.u32 %s506_s9, 4  ;;  %p435_p0 = scmp.ne.s32.totalorder %s564_s0, %s434_s13  ;;  %s16_s10 = int_to_ptr.vmem [resolvable:$true] %s15_s10 }
   0x4   :  { %p438_p1 = scmp.lt.u32.totalorder %s434_s13, %s564_s0 }
   0x6   :  { %p440_p2 = pnand %p438_p1, %p435_p0 }
   0x8   :  { %443 = shalt.err (!%p440_p2)
}
   0x9   :  { %s444_s18 = scalar_lea.vmem %s16_s10, 2048  ;;  %p449_p4 = scmp.lt.s32.totalorder %s16_s10, %s16_s10 }
   0xa   :  { %p445_p3 = scmp.ne.s32.totalorder %s16_s10, %s444_s18  ;;  %p450_p5 = scmp.lt.s32.totalorder %s444_s18, %s444_s18 }
   0xc   :  { %p451_p6 = por %p450_p5, %p449_p4 }
   0xe   :  { %p452_p7 = pnand %p451_p6, %p445_p3 }
  0x10   :  { %455 = shalt.err (!%p452_p7)
}
  0x11   :  { %s507_s19 = smov 128   ;;  %s508_s20 = smov 8  }
  0x12   :  { %21 = dma.hbm_to_vmem [thread:$0]  %s564_s0, 2048, %s16_s10, [#allocation3], %s507_s19, %s507_s19, %s508_s20  }
  0x13   :  { %s509_s23 = smov [#allocation5]   ;;  %s456_s27 = scalar_lea.hbm %s565_s1, 2048 }
  0x14   :  { %s27_s24 = sshll.u32 %s509_s23, 4  ;;  %p457_p8 = scmp.ne.s32.totalorder %s565_s1, %s456_s27  ;;  %s28_s24 = int_to_ptr.vmem [resolvable:$true] %s27_s24 }
  0x15   :  { %p460_p9 = scmp.lt.u32.totalorder %s456_s27, %s565_s1 }
  0x17   :  { %p462_p10 = pnand %p460_p9, %p457_p8 }
  0x19   :  { %465 = shalt.err (!%p462_p10)
}
  0x1a   :  { %s466_s4 = scalar_lea.vmem %s28_s24, 2048  ;;  %p471_p12 = scmp.lt.s32.totalorder %s28_s24, %s28_s24 }
  0x1b   :  { %p467_p11 = scmp.ne.s32.totalorder %s28_s24, %s466_s4  ;;  %p472_p13 = scmp.lt.s32.totalorder %s466_s4, %s466_s4 }
  0x1d   :  { %p473_p0 = por %p472_p13, %p471_p12 }
  0x1f   :  { %p474_p1 = pnand %p473_p0, %p467_p11 }
  0x21   :  { %477 = shalt.err (!%p474_p1)
}
  0x22   :  { %33 = dma.hbm_to_vmem [thread:$0]  %s565_s1, 2048, %s28_s24, [#allocation6], %s507_s19, %s507_s19, %s508_s20  }
  0x23   :  { %500 = dma.done.wait [#allocation3], 2048  }
  0x24   :  { %501 = vsyncadd [#allocation3], 4294965248 }
  0x25   :  { %502 = dma.done.wait [#allocation6], 2048  }
  0x26   :  { %503 = vsyncadd [#allocation6], 4294965248  ;;  %v65_v0 = vld [vmem:[#allocation5] sm:$0xff]  ;;  %v66_v1 = vld [vmem:[#allocation5 + $0x8] sm:$0xff]  ;;  %s510_s1 = smov [#allocation7]  }
  0x27   :  { %v67_v2 = vld [vmem:[#allocation5 + $0x10] sm:$0xff]  ;;  %v81_v3 = vpack.c.bf16 %v66_v1, %v65_v0  ;;  %v68_v4 = vld [vmem:[#allocation5 + $0x18] sm:$0xff]  ;;  %v69_v6 = vld [vmem:[#allocation5 + $0x20] sm:$0xff]  ;;  %s271_s6 = sshll.u32 %s510_s1, 4  ;;  %s272_s6 = int_to_ptr.vmem [resolvable:$true] %s271_s6 }
  0x28   :  { %v82_v5 = vpack.c.bf16 %v68_v4, %v67_v2  ;;  %v70_v7 = vld [vmem:[#allocation5 + $0x28] sm:$0xff]  ;;  %v71_v9 = vld [vmem:[#allocation5 + $0x30] sm:$0xff]  ;;  %v41_v10 = vld [vmem:[#allocation2] sm:$0xff]  ;;  %s478_s7 = scalar_lea.vmem %s272_s6, 1024  ;;  %p483_p3 = scmp.lt.s32.totalorder %s272_s6, %s272_s6 }
  0x29   :  { %379 = vmatprep.subr.bf16.mxu0 %v81_v3  ;;  %411 = vmatprep.subr.bf16.mxu1 %v81_v3  ;;  %v83_v8 = vpack.c.bf16 %v70_v7, %v69_v6  ;;  %v42_v11 = vld [vmem:[#allocation2 + $0x8] sm:$0xff]  ;;  %v72_v12 = vld [vmem:[#allocation5 + $0x38] sm:$0xff]  ;;  %v49_v14 = vld [vmem:[#allocation2 + $0x40] sm:$0xff]  ;;  %p479_p2 = scmp.ne.s32.totalorder %s272_s6, %s478_s7  ;;  %p484_p4 = scmp.lt.s32.totalorder %s478_s7, %s478_s7 }
  0x2a   :  { %380 = vmatpush3.bf16.msra.mxu0 %v81_v3  ;;  %419 = vmatpush3.bf16.msra.mxu1 %v81_v3  ;;  %v57_v13 = vpack.c.bf16 %v42_v11, %v41_v10  ;;  %v50_v15 = vld [vmem:[#allocation2 + $0x48] sm:$0xff]  ;;  %v84_v17 = vpack.c.bf16 %v72_v12, %v71_v9  ;;  %v73_v18 = vld [vmem:[#allocation5 + $0x40] sm:$0xff]  ;;  %v75_v21 = vld [vmem:[#allocation5 + $0x50] sm:$0xff] }
  0x2b   :  { %381 = vmatprep.subr.bf16.mxu0 %v82_v5  ;;  %412 = vmatprep.subr.bf16.mxu1 %v82_v5  ;;  %v61_v16 = vpack.c.bf16 %v50_v15, %v49_v14  ;;  %v74_v19 = vld [vmem:[#allocation5 + $0x48] sm:$0xff]  ;;  %v76_v22 = vld [vmem:[#allocation5 + $0x58] sm:$0xff]  ;;  %v77_v24 = vld [vmem:[#allocation5 + $0x60] sm:$0xff]  ;;  %p485_p5 = por %p484_p4, %p483_p3 }
  0x2c   :  { %395 = vmatprep.mubr.bf16.mxu0 %v57_v13  ;;  %v85_v20 = vpack.c.bf16 %v74_v19, %v73_v18  ;;  %v86_v23 = vpack.c.bf16 %v76_v22, %v75_v21  ;;  %v78_v25 = vld [vmem:[#allocation5 + $0x68] sm:$0xff]  ;;  %v79_v27 = vld [vmem:[#allocation5 + $0x70] sm:$0xff]  ;;  %v80_v28 = vld [vmem:[#allocation5 + $0x78] sm:$0xff] }
  0x2d   :  { %403 = vmatprep.mubr.bf16.mxu1 %v61_v16  ;;  %v87_v26 = vpack.c.bf16 %v78_v25, %v77_v24  ;;  %v88_v29 = vpack.c.bf16 %v80_v28, %v79_v27  ;;  %v43_v30 = vld [vmem:[#allocation2 + $0x10] sm:$0xff]  ;;  %v44_v31 = vld [vmem:[#allocation2 + $0x18] sm:$0xff]  ;;  %v45_v34 = vld [vmem:[#allocation2 + $0x20] sm:$0xff]  ;;  %p486_p6 = pnand %p485_p5, %p479_p2 }
  0x2e   :  { %382 = vmatpush3.bf16.msra.mxu0 %v82_v5  ;;  %420 = vmatpush3.bf16.msra.mxu1 %v82_v5  ;;  %v51_v32 = vld [vmem:[#allocation2 + $0x50] sm:$0xff]  ;;  %v52_v33 = vld [vmem:[#allocation2 + $0x58] sm:$0xff]  ;;  %v46_v35 = vld [vmem:[#allocation2 + $0x28] sm:$0xff]  ;;  %v58_v38 = vpack.c.bf16 %v44_v31, %v43_v30 }
  0x2f   :  { %383 = vmatprep.subr.bf16.mxu0 %v83_v8  ;;  %413 = vmatprep.subr.bf16.mxu1 %v83_v8  ;;  %v53_v36 = vld [vmem:[#allocation2 + $0x60] sm:$0xff]  ;;  %v54_v37 = vld [vmem:[#allocation2 + $0x68] sm:$0xff]  ;;  %v62_v39 = vpack.c.bf16 %v52_v33, %v51_v32  ;;  %v59_v40 = vpack.c.bf16 %v46_v35, %v45_v34  ;;  %v47_v42 = vld [vmem:[#allocation2 + $0x30] sm:$0xff] }
  0x30   :  { %v63_v41 = vpack.c.bf16 %v54_v37, %v53_v36  ;;  %v48_v43 = vld [vmem:[#allocation2 + $0x38] sm:$0xff]  ;;  %v55_v44 = vld [vmem:[#allocation2 + $0x70] sm:$0xff] }
  0x31   :  { %v56_v45 = vld [vmem:[#allocation2 + $0x78] sm:$0xff]  ;;  %v60_v46 = vpack.c.bf16 %v48_v43, %v47_v42 }
  0x32   :  { %384 = vmatpush3.bf16.msra.mxu0 %v83_v8  ;;  %421 = vmatpush3.bf16.msra.mxu1 %v83_v8  ;;  %v64_v47 = vpack.c.bf16 %v56_v45, %v55_v44 }
  0x33   :  { %385 = vmatprep.subr.bf16.mxu0 %v84_v17  ;;  %414 = vmatprep.subr.bf16.mxu1 %v84_v17 }
  0x36   :  { %386 = vmatpush3.bf16.msra.mxu0 %v84_v17  ;;  %422 = vmatpush3.bf16.msra.mxu1 %v84_v17 }
  0x37   :  { %387 = vmatprep.subr.bf16.mxu0 %v85_v20  ;;  %415 = vmatprep.subr.bf16.mxu1 %v85_v20 }
  0x3a   :  { %388 = vmatpush3.bf16.msra.mxu0 %v85_v20  ;;  %423 = vmatpush3.bf16.msra.mxu1 %v85_v20 }
  0x3b   :  { %389 = vmatprep.subr.bf16.mxu0 %v86_v23  ;;  %416 = vmatprep.subr.bf16.mxu1 %v86_v23 }
  0x3e   :  { %390 = vmatpush3.bf16.msra.mxu0 %v86_v23  ;;  %424 = vmatpush3.bf16.msra.mxu1 %v86_v23 }
  0x3f   :  { %391 = vmatprep.subr.bf16.mxu0 %v87_v26  ;;  %417 = vmatprep.subr.bf16.mxu1 %v87_v26 }
  0x42   :  { %392 = vmatpush3.bf16.msra.mxu0 %v87_v26  ;;  %425 = vmatpush3.bf16.msra.mxu1 %v87_v26 }
  0x43   :  { %393 = vmatprep.subr.bf16.mxu0 %v88_v29  ;;  %418 = vmatprep.subr.bf16.mxu1 %v88_v29 }
  0x46   :  { %394 = vmatpush3.bf16.msra.mxu0 %v88_v29  ;;  %426 = vmatpush3.bf16.msra.mxu1 %v88_v29 }
  0x49   :  { %396 = vmatmul.mubr.bf16.vlgmr.msra.gmra.mrb[0].mxu0 %v58_v38  ;;  %404 = vmatmul.mubr.bf16.vlgmr.msra.gmra.mrb[0].mxu1 %v62_v39 }
  0x4a   :  { %399 = vmatprep.mubr.bf16.mxu0 %v59_v40  ;;  %407 = vmatprep.mubr.bf16.mxu1 %v63_v41 }
  0x51   :  { %400 = vmatmul.mubr.bf16.gmra.mrb[4].mxu0 %v60_v46  ;;  %408 = vmatmul.mubr.bf16.gmra.mrb[4].mxu1 %v64_v47 }
 0x11c   :  { %v397_v48 = vpop.f32.mrb[0].mxu0  ;;  %v405_v49 = vpop.f32.mrb[0].mxu1 }
 0x11d   :  { %v123_v50 = vpop.f32.mrb[1].mxu0  ;;  %v155_v51 = vpop.f32.mrb[1].mxu1 }
 0x11e   :  { %v398_v52 = vpop.f32.mrb[2].mxu0  ;;  %v406_v53 = vpop.f32.mrb[2].mxu1 }
 0x11f   :  { %v324_v54 = vpack.c.bf16 %v398_v52, %v397_v48  ;;  %v344_v55 = vpack.c.bf16 %v406_v53, %v405_v49  ;;  %v126_v56 = vpop.f32.mrb[3].mxu0  ;;  %v158_v57 = vpop.f32.mrb[3].mxu1 }
 0x120   :  { %v319_v58 = vpack.c.bf16 %v126_v56, %v123_v50  ;;  %v339_v59 = vpack.c.bf16 %v158_v57, %v155_v51 }
 0x121   :  { %356 = vst [vmem:[#allocation7 + $0x8] sm:$0xff] %v324_v54   ;;  %360 = vst [vmem:[#allocation7 + $0x28] sm:$0xff] %v344_v55  }
 0x122   :  { %320 = vst [vmem:[#allocation7] sm:$0xff] %v319_v58   ;;  %359 = vst [vmem:[#allocation7 + $0x20] sm:$0xff] %v339_v59  }
 0x124   :  { %v401_v60 = vpop.f32.mrb[4].mxu0  ;;  %v409_v61 = vpop.f32.mrb[4].mxu1 }
 0x125   :  { %v139_v62 = vpop.f32.mrb[5].mxu0  ;;  %v171_v63 = vpop.f32.mrb[5].mxu1 }
 0x126   :  { %v402_v0 = vpop.f32.mrb[6].mxu0  ;;  %v410_v1 = vpop.f32.mrb[6].mxu1 }
 0x127   :  { %v334_v2 = vpack.c.bf16 %v402_v0, %v401_v60  ;;  %v354_v3 = vpack.c.bf16 %v410_v1, %v409_v61  ;;  %v142_v4 = vpop.f32.mrb[7].mxu0  ;;  %v174_v5 = vpop.f32.mrb[7].mxu1 }
 0x128   :  { %v329_v6 = vpack.c.bf16 %v142_v4, %v139_v62  ;;  %v349_v7 = vpack.c.bf16 %v174_v5, %v171_v63 }
 0x129   :  { %358 = vst [vmem:[#allocation7 + $0x18] sm:$0xff] %v334_v2   ;;  %362 = vst [vmem:[#allocation7 + $0x38] sm:$0xff] %v354_v3  }
 0x12a   :  { %357 = vst [vmem:[#allocation7 + $0x10] sm:$0xff] %v329_v6   ;;  %361 = vst [vmem:[#allocation7 + $0x30] sm:$0xff] %v349_v7  }
 0x12b   :  { %489 = shalt.err (!%p486_p6)
}
 0x12c   :  { %s490_s10 = scalar_lea.hbm %s566_s2, 1024 }
 0x12d   :  { %p491_p7 = scmp.ne.s32.totalorder %s566_s2, %s490_s10  ;;  %p494_p8 = scmp.lt.u32.totalorder %s490_s10, %s566_s2 }
 0x12f   :  { %p496_p9 = pnand %p494_p8, %p491_p7 }
 0x131   :  { %499 = shalt.err (!%p496_p9)
}
 0x132   :  { %s511_s15 = smov 64   ;;  %s512_s16 = smov 4  }
 0x133   :  { %277 = dma.vmem_to_hbm [thread:$0]  %s272_s6, 1024, %s566_s2, [#allocation4], %s511_s15, %s511_s15, %s512_s16  }
 0x134   :  { %504 = dma.done.wait [#allocation4], 1024  }
 0x135   :  { %505 = vsyncadd [#allocation4], 4294966272 }
 0x136   :  { %281 = vsyncpa [#allocation3], 1 }
 0x137   :  { %282 = vsyncpa [#allocation6], 1 }
 0x138   :  { %283 = vsyncpa [#allocation4], 1 }

</bundles_post_ra>
